<compile_context>
chip_gen: v7x
topology: tpu7x:2x2x1
jax: 0.10.0
libtpu: 0.0.40
codegen_flags: <defaults>
</compile_context>

<pallas_src>
import functools

import jax
import jax.numpy as jnp
from jax.experimental import pallas as pl
from jax.experimental.pallas import tpu as pltpu


def _round_up(x: int, m: int) -> int:
    return (x + m - 1) // m * m


def _mlp_kernel_single(x_ref, w1_ref, b1_ref, w2_ref, b2_ref, o_ref):
    # Grid = (M_tiles,).  Whole d_inter resident in one tile -> no accumulator.
    # x_ref:  [tm, d_model]
    # w1_ref: [d_model, d_inter_p]    b1_ref: [1, d_inter_p] (f32)
    # w2_ref: [d_inter_p, d_clip_p]   b2_ref: [1, d_clip_p]  (f32)
    # o_ref:  [tm, d_clip_p]
    h = jnp.dot(x_ref[...], w1_ref[...], preferred_element_type=jnp.float32)
    h = h + b1_ref[...]
    h = h * jax.nn.sigmoid(h)  # SiLU, f32
    out = jnp.dot(h.astype(w2_ref.dtype), w2_ref[...],
                  preferred_element_type=jnp.float32)
    o_ref[...] = (out + b2_ref[...]).astype(o_ref.dtype)


def _mlp_kernel_reduce(x_ref, w1_ref, b1_ref, w2_ref, b2_ref, o_ref, acc_ref):
    # Grid = (M_tiles, K_tiles) where K tiles d_inter (reduction, "arbitrary").
    # x_ref:  [tm, d_model]
    # w1_ref: [d_model, tn]    b1_ref: [1, tn]       (f32)
    # w2_ref: [tn, d_clip_p]   b2_ref: [1, d_clip_p] (f32)
    # o_ref:  [tm, d_clip_p]   acc_ref: [tm, d_clip_p] f32 scratch
    k = pl.program_id(1)

    @pl.when(k == 0)
    def _():
        acc_ref[...] = jnp.zeros_like(acc_ref)

    # First GEMM slice -> f32, bias add + SiLU in f32 on the (tm, tn) tile.
    h = jnp.dot(x_ref[...], w1_ref[...], preferred_element_type=jnp.float32)
    h = h + b1_ref[...]
    h = h * jax.nn.sigmoid(h)  # SiLU

    # Second GEMM partial sum, accumulated in f32.  Explicit precision policy:
    # SiLU output cast to the weight compute dtype (f32 or bf16) for the MXU.
    acc_ref[...] += jnp.dot(h.astype(w2_ref.dtype), w2_ref[...],
                            preferred_element_type=jnp.float32)

    @pl.when(k == pl.num_programs(1) - 1)
    def _():
        o_ref[...] = (acc_ref[...] + b2_ref[...]).astype(o_ref.dtype)


@functools.partial(jax.jit, static_argnames=("tm", "tn", "compute_dtype"))
def mlp_transform(x, w1, b1, w2, b2, *, tm=256, tn=512, compute_dtype=None):
    """x: [..., d_model] -> [..., d_clip].

    w1: [d_model, d_inter], b1: [d_inter], w2: [d_inter, d_clip], b2: [d_clip].
    compute_dtype: optional dtype (e.g. jnp.bfloat16) for x/w1/w2 on the MXU;
    accumulation, bias adds and SiLU remain f32.
    """
    d_model = x.shape[-1]
    d_inter = w1.shape[1]
    d_clip = w2.shape[1]
    lead = x.shape[:-1]
    out_dtype = x.dtype

    x2d = x.reshape(-1, d_model)
    M = x2d.shape[0]

    if compute_dtype is not None:
        x2d = x2d.astype(compute_dtype)
        w1 = w1.astype(compute_dtype)
        w2 = w2.astype(compute_dtype)
    b1 = b1.astype(jnp.float32)
    b2 = b2.astype(jnp.float32)

    # Tile sizes: clamp to the (padded) problem so tiny inputs are not blown up.
    tm_eff = min(_round_up(tm, 8), _round_up(M, 8))
    tn_eff = min(_round_up(tn, 128), _round_up(d_inter, 128))

    # Zero-padding is exact: padded d_inter columns give h=0, SiLU(0)=0, and the
    # matching w2 rows are zero; padded d_clip columns are sliced off below.
    M_pad = _round_up(M, tm_eff)
    d_inter_pad = _round_up(d_inter, tn_eff)
    d_clip_pad = _round_up(d_clip, 128)  # lane-dense output (unmasked stores)

    if M_pad != M:
        x2d = jnp.pad(x2d, ((0, M_pad - M), (0, 0)))
    if d_inter_pad != d_inter:
        w1 = jnp.pad(w1, ((0, 0), (0, d_inter_pad - d_inter)))
        b1 = jnp.pad(b1, ((0, d_inter_pad - d_inter),))
        w2 = jnp.pad(w2, ((0, d_inter_pad - d_inter), (0, 0)))
    if d_clip_pad != d_clip:
        w2 = jnp.pad(w2, ((0, 0), (0, d_clip_pad - d_clip)))
        b2 = jnp.pad(b2, ((0, d_clip_pad - d_clip),))

    b1_2d = b1.reshape(1, d_inter_pad)
    b2_2d = b2.reshape(1, d_clip_pad)

    n_k = d_inter_pad // tn_eff

    itemsize = lambda a: jnp.dtype(a.dtype).itemsize
    cost = pl.CostEstimate(
        flops=2 * M * (d_model * d_inter + d_inter * d_clip),
        transcendentals=M * d_inter,  # sigmoid
        bytes_accessed=(x2d.size * itemsize(x2d)
                        + w1.size * itemsize(w1) + w2.size * itemsize(w2)
                        + b1_2d.size * 4 + b2_2d.size * 4
                        + M_pad * d_clip_pad * jnp.dtype(out_dtype).itemsize),
    )

    if n_k == 1:
        # Whole d_inter fits in one tile: single-shot kernel, no accumulator,
        # no reduction grid axis (fewer grid steps, no scratch traffic).
        out = pl.pallas_call(
            _mlp_kernel_single,
            out_shape=jax.ShapeDtypeStruct((M_pad, d_clip_pad), out_dtype),
            grid_spec=pltpu.PrefetchScalarGridSpec(
                num_scalar_prefetch=0,
                grid=(M_pad // tm_eff,),
                in_specs=[
                    pl.BlockSpec((tm_eff, d_model), lambda i: (i, 0)),
                    pl.BlockSpec((d_model, d_inter_pad), lambda i: (0, 0)),
                    pl.BlockSpec((1, d_inter_pad), lambda i: (0, 0)),
                    pl.BlockSpec((d_inter_pad, d_clip_pad), lambda i: (0, 0)),
                    pl.BlockSpec((1, d_clip_pad), lambda i: (0, 0)),
                ],
                out_specs=pl.BlockSpec((tm_eff, d_clip_pad), lambda i: (i, 0)),
            ),
            compiler_params=pltpu.CompilerParams(
                dimension_semantics=("parallel",)),
            cost_estimate=cost,
        )(x2d, w1, b1_2d, w2, b2_2d)
    else:
        # Large d_inter: stream weight slices over the reduction grid axis.
        out = pl.pallas_call(
            _mlp_kernel_reduce,
            out_shape=jax.ShapeDtypeStruct((M_pad, d_clip_pad), out_dtype),
            grid_spec=pltpu.PrefetchScalarGridSpec(
                num_scalar_prefetch=0,
                grid=(M_pad // tm_eff, n_k),
                in_specs=[
                    pl.BlockSpec((tm_eff, d_model), lambda i, k: (i, 0)),     # x rows
                    pl.BlockSpec((d_model, tn_eff), lambda i, k: (0, k)),     # w1 slice
                    pl.BlockSpec((1, tn_eff), lambda i, k: (0, k)),           # b1 slice
                    pl.BlockSpec((tn_eff, d_clip_pad), lambda i, k: (k, 0)),  # w2 slice
                    pl.BlockSpec((1, d_clip_pad), lambda i, k: (0, 0)),       # b2
                ],
                out_specs=pl.BlockSpec((tm_eff, d_clip_pad), lambda i, k: (i, 0)),
                scratch_shapes=[pltpu.VMEM((tm_eff, d_clip_pad), jnp.float32)],
            ),
            compiler_params=pltpu.CompilerParams(
                dimension_semantics=("parallel", "arbitrary")),
            cost_estimate=cost,
        )(x2d, w1, b1_2d, w2, b2_2d)

    out = out[:M, :d_clip]
    return out.reshape(*lead, d_clip)


def reference_mlp(x, w1, b1, w2, b2):
    h = jnp.dot(x, w1) + b1
    h = h * jax.nn.sigmoid(h)
    return jnp.dot(h, w2) + b2


if __name__ == "__main__":
    key = jax.random.PRNGKey(0)

    def make_params(k, d_model, d_inter, d_clip):
        k1, kb1, k2, kb2 = jax.random.split(k, 4)
        bound1 = 1.0 / (d_model ** 0.5)
        bound2 = 1.0 / (d_inter ** 0.5)
        w1 = jax.random.uniform(k1, (d_model, d_inter), jnp.float32, -bound1, bound1)
        b1 = jax.random.uniform(kb1, (d_inter,), jnp.float32, -bound1, bound1)
        w2 = jax.random.uniform(k2, (d_inter, d_clip), jnp.float32, -bound2, bound2)
        b2 = jax.random.uniform(kb2, (d_clip,), jnp.float32, -bound2, bound2)
        return w1, b1, w2, b2

    # --- Test 1: module defaults (d_inter = 4*d_model), small leading dims ----
    # Single-shot path (d_inter fits one tile).
    d_model, d_clip = 32, 64
    d_inter = d_model * 4
    kx, kp, key = jax.random.split(key, 3)
    x = jax.random.normal(kx, (2, 8, d_model), dtype=jnp.float32)
    w1, b1, w2, b2 = make_params(kp, d_model, d_inter, d_clip)

    out = jax.block_until_ready(mlp_transform(x, w1, b1, w2, b2))
    ref = reference_mlp(x, w1, b1, w2, b2)
    assert out.shape == (2, 8, d_clip), out.shape
    assert jnp.allclose(out, ref, atol=1e-5, rtol=1e-5), "f32 mismatch (test 1)"

    # --- Test 2: explicit d_inter, tiled reduction, M not divisible by tile ---
    d_model2, d_inter2, d_clip2 = 32, 256, 64
    kx2, kp2, key = jax.random.split(key, 3)
    x2 = jax.random.normal(kx2, (3, 10, d_model2), dtype=jnp.float32)  # M = 30
    p2 = make_params(kp2, d_model2, d_inter2, d_clip2)

    out2 = jax.block_until_ready(mlp_transform(x2, *p2, tn=128))  # 2 reduction steps
    ref2 = reference_mlp(x2, *p2)
    assert out2.shape == (3, 10, d_clip2), out2.shape
    assert jnp.allclose(out2, ref2, atol=1e-5, rtol=1e-5), "f32 mismatch (test 2)"

    # --- Test 3: bf16 compute path (f32 accumulation), looser tolerance -------
    out3 = jax.block_until_ready(
        mlp_transform(x2, *p2, tn=128, compute_dtype=jnp.bfloat16))
    assert jnp.allclose(out3, ref2, atol=2e-2, rtol=2e-2), "bf16 mismatch (test 3)"

    print("KERNEL_OK")
</pallas_src>

<mosaic_0001>
module attributes {stable_mosaic.version = 11 : i64} {
  func.func @_mlp_kernel_single(%arg0: i32, %arg1: memref<16x32xf32, #tpu.memory_space<vmem>>, %arg2: memref<32x128xf32, #tpu.memory_space<vmem>>, %arg3: memref<1x128xf32, #tpu.memory_space<vmem>>, %arg4: memref<128x128xf32, #tpu.memory_space<vmem>>, %arg5: memref<1x128xf32, #tpu.memory_space<vmem>>, %arg6: memref<16x128xf32, #tpu.memory_space<vmem>>) attributes {dimension_semantics = [#tpu.dimension_semantics<parallel>], iteration_bounds = array<i64: 1>, scalar_prefetch = 0 : i64, scratch_operands = 0 : i64, tpu.core_type = #tpu.core_type<tc>, window_params = [{transform_indices = @transform_0, window_bounds = array<i64: 16, 32>}, {pipeline_mode = #tpu.pipeline_mode<synchronous>, transform_indices = @transform_1, window_bounds = array<i64: 32, 128>}, {pipeline_mode = #tpu.pipeline_mode<synchronous>, transform_indices = @transform_2, window_bounds = array<i64: 1, 128>}, {pipeline_mode = #tpu.pipeline_mode<synchronous>, transform_indices = @transform_3, window_bounds = array<i64: 128, 128>}, {pipeline_mode = #tpu.pipeline_mode<synchronous>, transform_indices = @transform_4, window_bounds = array<i64: 1, 128>}, {transform_indices = @transform_5, window_bounds = array<i64: 16, 128>}]} {
    %c0 = arith.constant 0 : index
    %c0_0 = arith.constant 0 : index
    %0 = vector.load %arg1[%c0, %c0_0] : memref<16x32xf32, #tpu.memory_space<vmem>>, vector<16x32xf32>
    %c0_1 = arith.constant 0 : index
    %c0_2 = arith.constant 0 : index
    %1 = vector.load %arg2[%c0_1, %c0_2] : memref<32x128xf32, #tpu.memory_space<vmem>>, vector<32x128xf32>
    %cst = arith.constant dense<0.000000e+00> : vector<16x128xf32>
    %2 = tpu.matmul %0, %1, %cst {dimension_numbers = #tpu.dot_dimension_numbers<[1], [0], [0], [1], [0, 0, 1, 1], [], []>} : vector<16x32xf32>, vector<32x128xf32>, vector<16x128xf32> -> vector<16x128xf32>
    %c0_3 = arith.constant 0 : index
    %c0_4 = arith.constant 0 : index
    %3 = vector.load %arg3[%c0_3, %c0_4] : memref<1x128xf32, #tpu.memory_space<vmem>>, vector<1x128xf32>
    %4 = vector.broadcast %3 : vector<1x128xf32> to vector<16x128xf32>
    %5 = arith.addf %2, %4 : vector<16x128xf32>
    %6 = arith.negf %5 : vector<16x128xf32>
    %7 = math.exp %6 : vector<16x128xf32>
    %cst_5 = arith.constant 1.000000e+00 : f32
    %8 = vector.broadcast %cst_5 : f32 to vector<16x128xf32>
    %9 = arith.addf %8, %7 : vector<16x128xf32>
    %10 = arith.divf %8, %9 : vector<16x128xf32>
    %11 = arith.mulf %5, %10 : vector<16x128xf32>
    %c0_6 = arith.constant 0 : index
    %c0_7 = arith.constant 0 : index
    %12 = vector.load %arg4[%c0_6, %c0_7] : memref<128x128xf32, #tpu.memory_space<vmem>>, vector<128x128xf32>
    %cst_8 = arith.constant dense<0.000000e+00> : vector<16x128xf32>
    %13 = tpu.matmul %11, %12, %cst_8 {dimension_numbers = #tpu.dot_dimension_numbers<[1], [0], [0], [1], [0, 0, 1, 1], [], []>} : vector<16x128xf32>, vector<128x128xf32>, vector<16x128xf32> -> vector<16x128xf32>
    %c0_9 = arith.constant 0 : index
    %c0_10 = arith.constant 0 : index
    %14 = vector.load %arg5[%c0_9, %c0_10] : memref<1x128xf32, #tpu.memory_space<vmem>>, vector<1x128xf32>
    %15 = vector.broadcast %14 : vector<1x128xf32> to vector<16x128xf32>
    %16 = arith.addf %13, %15 : vector<16x128xf32>
    %c0_11 = arith.constant 0 : index
    %c0_12 = arith.constant 0 : index
    %17 = vector.load %arg6[%c0_11, %c0_12] : memref<16x128xf32, #tpu.memory_space<vmem>>, vector<16x128xf32>
    tpu.vector_store %arg6[%c0_11, %c0_12], %16 {strides = array<i32>} : memref<16x128xf32, #tpu.memory_space<vmem>>, vector<16x128xf32>,
    return
  }
  func.func @transform_0(%arg0: i32) -> (i32, i32) {
    %c0_i32 = arith.constant 0 : i32
    %c0_i32_0 = arith.constant 0 : i32
    return %arg0, %c0_i32 : i32, i32
  }
  func.func @transform_1(%arg0: i32) -> (i32, i32) {
    %c0_i32 = arith.constant 0 : i32
    %c0_i32_0 = arith.constant 0 : i32
    %c0_i32_1 = arith.constant 0 : i32
    return %c0_i32, %c0_i32_0 : i32, i32
  }
  func.func @transform_2(%arg0: i32) -> (i32, i32) {
    %c0_i32 = arith.constant 0 : i32
    %c0_i32_0 = arith.constant 0 : i32
    %c0_i32_1 = arith.constant 0 : i32
    return %c0_i32, %c0_i32_0 : i32, i32
  }
  func.func @transform_3(%arg0: i32) -> (i32, i32) {
    %c0_i32 = arith.constant 0 : i32
    %c0_i32_0 = arith.constant 0 : i32
    %c0_i32_1 = arith.constant 0 : i32
    return %c0_i32, %c0_i32_0 : i32, i32
  }
  func.func @transform_4(%arg0: i32) -> (i32, i32) {
    %c0_i32 = arith.constant 0 : i32
    %c0_i32_0 = arith.constant 0 : i32
    %c0_i32_1 = arith.constant 0 : i32
    return %c0_i32, %c0_i32_0 : i32, i32
  }
  func.func @transform_5(%arg0: i32) -> (i32, i32) {
    %c0_i32 = arith.constant 0 : i32
    %c0_i32_0 = arith.constant 0 : i32
    return %arg0, %c0_i32 : i32, i32
  }
}

</mosaic_0001>

<bundles_post_ra>
// kernel: mlp_transform.1
= control target key start
LH: loop header
LB: loop body
LE: loop exit
PB: predicated region body
PF: predicated region fallthrough
CT: control target
= control target key end

     0   :  { %vm33_vm0 = vcmask 261120   ;;  %s465_s1 = inlined_call_operand.vmem [shape: f32[32,128], index: 1, kind: input, shape index: {}]   ;;  %s466_s0 = inlined_call_operand.vmem [shape: f32[16,32], index: 0, kind: input, shape index: {}]   ;;  %s467_s3 = inlined_call_operand.vmem [shape: f32[128,128], index: 3, kind: input, shape index: {}]   ;;  %s468_s2 = inlined_call_operand.vmem [shape: f32[1,128], index: 2, kind: input, shape index: {}]   ;;  %s469_s4 = inlined_call_operand.vmem [shape: f32[1,128], index: 4, kind: input, shape index: {}]   ;;  %s470_s5 = inlined_call_operand.vmem [shape: f32[16,128], index: 5, kind: output, shape index: {}]  }
   0x1   :  { %v22_v0 = vld [vmem:[%s465_s1] sm:$0xff]  ;;  %v23_v1 = vld [vmem:[%s465_s1 + $0x8] sm:$0xff]  ;;  %v24_v2 = vld [vmem:[%s465_s1 + $0x10] sm:$0xff] }
   0x2   :  { %v309_v3 = vpack.c.bf16 %v23_v1, %v22_v0  ;;  %v25_v4 = vld [vmem:[%s465_s1 + $0x18] sm:$0xff]  ;;  %v20_v5 = vld [vmem:[%s466_s0] sm:$0xff]  ;;  %v21_v7 = vld [vmem:[%s466_s0 + $0x8] sm:$0xff] }
   0x3   :  { %v313_v6 = vpack.c.bf16 %v25_v4, %v24_v2  ;;  %271 = vmatprep.mubr.msk.f32.mxu0 %vm33_vm0, %v20_v5  ;;  %v129_v8 = vld [vmem:[%s467_s3] sm:$0xff]  ;;  %v130_v9 = vld [vmem:[%s467_s3 + $0x8] sm:$0xff]  ;;  %v131_v11 = vld [vmem:[%s467_s3 + $0x10] sm:$0xff] }
   0x4   :  { %310 = vmatprep.subr.bf16.mxu0 %v309_v3  ;;  %v317_v10 = vpack.c.bf16 %v130_v9, %v129_v8  ;;  %v132_v12 = vld [vmem:[%s467_s3 + $0x18] sm:$0xff]  ;;  %v133_v14 = vld [vmem:[%s467_s3 + $0x20] sm:$0xff]  ;;  %v134_v15 = vld [vmem:[%s467_s3 + $0x28] sm:$0xff] }
   0x5   :  { %312 = vmatpush3.bf16.msra.mxu0 %v309_v3  ;;  %v321_v13 = vpack.c.bf16 %v132_v12, %v131_v11  ;;  %v325_v16 = vpack.c.bf16 %v134_v15, %v133_v14  ;;  %v135_v17 = vld [vmem:[%s467_s3 + $0x30] sm:$0xff]  ;;  %v136_v18 = vld [vmem:[%s467_s3 + $0x38] sm:$0xff]  ;;  %v137_v20 = vld [vmem:[%s467_s3 + $0x40] sm:$0xff] }
   0x6   :  { %314 = vmatprep.subr.bf16.mxu0 %v313_v6  ;;  %318 = vmatprep.subr.bf16.mxu1 %v317_v10  ;;  %v329_v19 = vpack.c.bf16 %v136_v18, %v135_v17  ;;  %v138_v21 = vld [vmem:[%s467_s3 + $0x48] sm:$0xff]  ;;  %v139_v23 = vld [vmem:[%s467_s3 + $0x50] sm:$0xff]  ;;  %v140_v24 = vld [vmem:[%s467_s3 + $0x58] sm:$0xff] }
   0x7   :  { %320 = vmatpush3.bf16.msra.mxu1 %v317_v10  ;;  %v333_v22 = vpack.c.bf16 %v138_v21, %v137_v20  ;;  %v337_v25 = vpack.c.bf16 %v140_v24, %v139_v23  ;;  %v141_v26 = vld [vmem:[%s467_s3 + $0x60] sm:$0xff]  ;;  %v142_v27 = vld [vmem:[%s467_s3 + $0x68] sm:$0xff]  ;;  %v143_v29 = vld [vmem:[%s467_s3 + $0x70] sm:$0xff] }
   0x8   :  { %322 = vmatprep.subr.bf16.mxu1 %v321_v13  ;;  %v341_v28 = vpack.c.bf16 %v142_v27, %v141_v26  ;;  %v144_v30 = vld [vmem:[%s467_s3 + $0x78] sm:$0xff]  ;;  %v233_v32 = vld [vmem:[%s468_s2] ss:$0 sm:$0xff] }
   0x9   :  { %316 = vmatpush3.bf16.msra.mxu0 %v313_v6  ;;  %v345_v31 = vpack.c.bf16 %v144_v30, %v143_v29  ;;  %v238_v47 = vld [vmem:[%s469_s4] ss:$0 sm:$0xff] }
   0xb   :  { %324 = vmatpush3.bf16.msra.mxu1 %v321_v13 }
   0xc   :  { %272 = vmatmul.mubr.msk.f32.vlgmr.msra.gmra.mrb[0].mxu0 %vm33_vm0, %v21_v7  ;;  %326 = vmatprep.subr.bf16.mxu1 %v325_v16 }
   0xf   :  { %328 = vmatpush3.bf16.msra.mxu1 %v325_v16 }
  0x10   :  { %330 = vmatprep.subr.bf16.mxu1 %v329_v19 }
  0x13   :  { %332 = vmatpush3.bf16.msra.mxu1 %v329_v19 }
  0x14   :  { %334 = vmatprep.subr.bf16.mxu1 %v333_v22 }
  0x17   :  { %336 = vmatpush3.bf16.msra.mxu1 %v333_v22 }
  0x18   :  { %338 = vmatprep.subr.bf16.mxu1 %v337_v25 }
  0x1b   :  { %340 = vmatpush3.bf16.msra.mxu1 %v337_v25 }
  0x1c   :  { %342 = vmatprep.subr.bf16.mxu1 %v341_v28 }
  0x1f   :  { %344 = vmatpush3.bf16.msra.mxu1 %v341_v28 }
  0x20   :  { %346 = vmatprep.subr.bf16.mxu1 %v345_v31 }
  0x23   :  { %348 = vmatpush3.bf16.msra.mxu1 %v345_v31 }
  0xdf   :  { %v273_v33 = vpop.f32.mrb[0].mxu0 }
  0xe0   :  { %v112_v34 = vadd.f32 %v273_v33, %v233_v32  ;;  %v106_v35 = vpop.f32.mrb[1].mxu0 }
  0xe1   :  { %v107_v36 = vadd.f32 %v233_v32, %v106_v35 }
  0xe2   :  { %v237_v37 = vmul.f32 -1.442695, %v112_v34 }
  0xe3   :  { %v236_v38 = vmul.f32 -1.442695, %v107_v36 }
  0xe4   :  { %349 = vpow2.f32 %v237_v37 }
  0xe5   :  { %351 = vpow2.f32 %v236_v38 }
  0xee   :  { %v350_v39 = vpop.eup %349 }
  0xef   :  { %v352_v40 = vpop.eup %351  ;;  %v122_v41 = vadd.f32 1.0, %v350_v39 }
  0xf0   :  { %v121_v42 = vadd.f32 1.0, %v352_v40 }
  0xf1   :  { %353 = vrcp.f32 %v122_v41 }
  0xf2   :  { %355 = vrcp.f32 %v121_v42 }
  0xfb   :  { %v354_v43 = vpop.eup %353 }
  0xfc   :  { %v356_v44 = vpop.eup %355  ;;  %v128_v46 = vmul.f32 %v354_v43, %v112_v34 }
  0xfd   :  { %v127_v45 = vmul.f32 %v356_v44, %v107_v36 }
  0xff   :  { %306 = vmatprep.mubr.f32.mxu1 %v127_v45 }
 0x100   :  { %307 = vmatmul.mubr.f32.vlgmr.msra.gmra.mrb[0].mxu1 %v128_v46 }
 0x1d3   :  { %v308_v48 = vpop.f32.mrb[0].mxu1 }
 0x1d4   :  { %v224_v49 = vadd.f32 %v308_v48, %v238_v47  ;;  %v218_v50 = vpop.f32.mrb[1].mxu1 }
 0x1d5   :  { %v219_v51 = vadd.f32 %v238_v47, %v218_v50 }
 0x1d6   :  { %228 = vst [vmem:[%s470_s5 + $0x8] sm:$0xff] %v224_v49 }
 0x1d7   :  { %227 = vst [vmem:[%s470_s5] sm:$0xff] %v219_v51 }

</bundles_post_ra>
